<compile_context>
chip_gen: v6e
topology: v6e:2x2x1
jax: 0.10.0
libtpu: 0.0.40
codegen_flags: <defaults>
</compile_context>

<pallas_src>
import jax
import jax.numpy as jnp
from jax.experimental import pallas as pl
from jax.experimental.pallas import tpu as pltpu


def _self_attention_kernel(x_ref, w1_ref, b1_ref, w2_ref, o_ref):
    # x_ref : (TB, S, H) block of encoder_outputs (f32 or bf16)
    # w1_ref: (H, 16)   b1_ref: (1, 16)   w2_ref: (1, 16)
    # o_ref : (TB, H)
    TB, S, H = x_ref.shape
    x = x_ref[...]
    # In-VMEM upcast: no-op for f32 inputs; for bf16 inputs the HBM stream is
    # still bf16 (the bandwidth win) and all arithmetic below stays f32.
    xf = x.astype(jnp.float32)                                   # (TB, S, H)

    # ---- first_linear + tanh: one dense (TB*S, H) @ (H, 16) MXU matmul ----
    # NOTE: if S % 8 != 0 this collapse crosses the f32 sublane tile and may
    # materialize a relayout copy; pad S to a multiple of 8 for real shapes.
    first = jnp.dot(xf.reshape(TB * S, H), w1_ref[...],
                    preferred_element_type=jnp.float32)          # (TB*S, 16)
    t = jnp.tanh(first + b1_ref[...]).reshape(TB, S, 16)         # (TB, S, 16)

    # ---- second_linear (16 -> 1): lane reduce over the 16 hidden units ----
    # (second_linear bias omitted: constant shift cancels in the softmax)
    energy = jnp.sum(t * w2_ref[...], axis=-1)                   # (TB, S), S lane-major

    # ---- softmax over the sequence axis (lanes) ----
    m = jnp.max(energy, axis=-1, keepdims=True)                  # (TB, 1)
    e = jnp.exp(energy - m)                                      # (TB, S)
    denom = jnp.sum(e, axis=-1, keepdims=True)                   # (TB, 1)
    attn = e * pl.reciprocal(denom, approx=False)                # exact normalization

    # ---- attention-weighted sum over S ----
    # (the PyTorch sum(dim=1) is a no-op: the "head" dim is 1 after 16->1)
    if S <= 32:
        # VPU form: S broadcast-FMAs on (TB, H) slabs; avoids TB degenerate
        # M=1 MXU matvecs.  Compute rides slots that are idle at mem-bound.
        out = jnp.sum(attn[..., None] * xf, axis=1)              # (TB, H) f32
    else:
        # Batched MXU matmul for long sequences.
        out = jnp.einsum("bqs,bsh->bqh", attn[:, None, :], xf,
                         preferred_element_type=jnp.float32)[:, 0, :]
    o_ref[...] = out.astype(o_ref.dtype)


def _vmem_budget_bytes():
    """Generation-specific scoped-VMEM budget.

    v5e / v6e: 128 MiB physical (16 / 32 MiB scoped default) -> raise to 96 MiB.
    v7x: 64 MiB per TensorCore -> 48 MiB.  Conservative 48 MiB fallback if the
    hardware query is unavailable.
    """
    try:
        cap = pltpu.get_tpu_info().vmem_capacity_bytes
    except Exception:
        cap = 64 * 1024 * 1024
    if cap >= 96 * 1024 * 1024:
        return 96 * 1024 * 1024
    return 48 * 1024 * 1024


def self_attention(x, w1, b1, w2, b2=None, *, block_b=None, vmem_limit_bytes=None):
    """x: (B, S, H) f32 or bf16.  Returns (B, H) in x.dtype.

    b2 is accepted for parity with the PyTorch module but is mathematically a
    no-op (constant energy shift before softmax), so it is not sent to the TPU.

    block_b=None lets the batch-block size default to the VMEM-derived maximum
    (~6-8 MiB per x buffer), capped so the grid keeps >= 2 steps for the v7x
    two-TensorCore split.
    """
    del b2
    B, S, H = x.shape
    itemsize = jnp.dtype(x.dtype).itemsize
    align = 8 * max(1, 4 // itemsize)      # sublane tile: 8 (f32), 16 (bf16)

    if vmem_limit_bytes is None:
        vmem_limit_bytes = _vmem_budget_bytes()

    # --- batch-block size from the VMEM budget ---------------------------
    # Per-buffer x tile target: ~8 MiB, but leave room for 2 double-buffered
    # input copies, the in-kernel f32 upcast / weighted-sum temporaries and
    # the output buffers (hence the /8).
    per_batch_bytes = S * H * itemsize
    tile_budget = min(8 * 1024 * 1024, vmem_limit_bytes // 8)
    max_tb = max(1, tile_budget // per_batch_bytes)
    tb = max_tb if block_b is None else max(1, min(block_b, max_tb))
    tb = min(tb, B)
    # Keep >= 2 grid steps so a v7x megacore can shard the batch axis;
    # costs ~0.35 us on single-TensorCore chips (negligible at these tiles).
    if B > align:
        two_step = ((pl.cdiv(B, 2) + align - 1) // align) * align
        if two_step < B:
            tb = min(tb, two_step)
    if B >= align:
        # Sublane/lane-dense output blocks (tb multiple of the sublane tile).
        tb = max(align, (tb // align) * align)
    else:
        tb = B                              # single full-dim block
    # TODO(synk): if a single (align, S, H) slab exceeds the VMEM budget
    # (huge S*H), tile S and use an online-softmax accumulator instead.

    # Ragged last block instead of jnp.pad(x): padding would cost a full extra
    # HBM read+write of x.  Rows are independent and OOB output writes are
    # masked, so garbage reads in the last block cannot corrupt valid rows.
    grid = pl.cdiv(B, tb)

    return pl.pallas_call(
        _self_attention_kernel,
        out_shape=jax.ShapeDtypeStruct((B, H), x.dtype),
        grid_spec=pltpu.PrefetchScalarGridSpec(
            num_scalar_prefetch=0,
            grid=(grid,),
            in_specs=[
                pl.BlockSpec((tb, S, H), lambda i: (i, 0, 0)),   # x (batch block)
                pl.BlockSpec((H, 16), lambda i: (0, 0)),         # w1
                pl.BlockSpec((1, 16), lambda i: (0, 0)),         # b1
                pl.BlockSpec((1, 16), lambda i: (0, 0)),         # w2 (row)
            ],
            out_specs=pl.BlockSpec((tb, H), lambda i: (i, 0)),   # lane-dense (TB, H)
        ),
        compiler_params=pltpu.CompilerParams(
            dimension_semantics=("parallel",),
            vmem_limit_bytes=vmem_limit_bytes),
    )(x, w1, b1, w2)


def self_attention_reference(x, w1, b1, w2, b2):
    """Pure-JAX reference mirroring the PyTorch forward."""
    first_hidden = jnp.einsum("bsh,hk->bsk", x, w1) + b1            # (B,S,16)
    energy = jnp.einsum("bsk,k->bs", jnp.tanh(first_hidden),
                        w2[0])[..., None] + b2[0, 0]                # (B,S,1)
    attention = jax.nn.softmax(energy, axis=1)                      # (B,S,1)
    attention = jnp.swapaxes(attention, 1, 2)                       # (B,1,S)
    sentence_embeddings = attention @ x                             # (B,1,H)
    return sentence_embeddings.sum(axis=1)                          # (B,H)


if __name__ == "__main__":
    # Small deterministic shapes; H multiple of 128 keeps output stores
    # lane-dense, B=16 gives an even 2-step grid on the f32 path.
    B, S, H = 16, 8, 128
    key = jax.random.PRNGKey(0)
    kx, kw1, kw2 = jax.random.split(key, 3)

    x = jax.random.normal(kx, (B, S, H), dtype=jnp.float32)

    # Deterministic parameter init (module __init__ zero-fills biases).
    # first_linear: Linear(hidden, 16) -> weight (16, H), stored transposed (H, 16)
    # second_linear: Linear(16, 1)     -> weight (1, 16)
    w1 = (jax.random.uniform(kw1, (H, 16), dtype=jnp.float32,
                             minval=-1.0, maxval=1.0) / jnp.sqrt(float(H)))
    b1 = jnp.zeros((1, 16), dtype=jnp.float32)
    w2 = (jax.random.uniform(kw2, (1, 16), dtype=jnp.float32,
                             minval=-1.0, maxval=1.0) / 4.0)
    b2 = jnp.zeros((1, 1), dtype=jnp.float32)

    ref = jax.block_until_ready(self_attention_reference(x, w1, b1, w2, b2))

    # ---- f32 path ----
    out = jax.block_until_ready(self_attention(x, w1, b1, w2, b2))
    assert out.shape == (B, H), out.shape
    assert jnp.allclose(out, ref, atol=5e-3, rtol=5e-3), (
        "f32 mismatch", float(jnp.max(jnp.abs(out - ref))))

    # ---- bf16 path: halves HBM bytes on the dominant (B,S,H) stream ----
    out_bf = jax.block_until_ready(
        self_attention(x.astype(jnp.bfloat16), w1, b1, w2, b2))
    assert out_bf.shape == (B, H) and out_bf.dtype == jnp.bfloat16
    assert jnp.allclose(out_bf.astype(jnp.float32), ref, atol=1e-1, rtol=1e-1), (
        "bf16 mismatch", float(jnp.max(jnp.abs(out_bf.astype(jnp.float32) - ref))))

    print("KERNEL_OK")
</pallas_src>

<mosaic_0001>
module attributes {stable_mosaic.version = 11 : i64} {
  func.func @_self_attention_kernel(%arg0: i32, %arg1: memref<8x8x128xf32, #tpu.memory_space<vmem>>, %arg2: memref<128x16xf32, #tpu.memory_space<vmem>>, %arg3: memref<1x16xf32, #tpu.memory_space<vmem>>, %arg4: memref<1x16xf32, #tpu.memory_space<vmem>>, %arg5: memref<8x128xf32, #tpu.memory_space<vmem>>) attributes {dimension_semantics = [#tpu.dimension_semantics<parallel>], iteration_bounds = array<i64: 2>, scalar_prefetch = 0 : i64, scratch_operands = 0 : i64, tpu.core_type = #tpu.core_type<tc>, window_params = [{transform_indices = @transform_0, window_bounds = array<i64: 8, 8, 128>}, {pipeline_mode = #tpu.pipeline_mode<synchronous>, transform_indices = @transform_1, window_bounds = array<i64: 128, 16>}, {pipeline_mode = #tpu.pipeline_mode<synchronous>, transform_indices = @transform_2, window_bounds = array<i64: 1, 16>}, {pipeline_mode = #tpu.pipeline_mode<synchronous>, transform_indices = @transform_3, window_bounds = array<i64: 1, 16>}, {transform_indices = @transform_4, window_bounds = array<i64: 8, 128>}]} {
    %c0 = arith.constant 0 : index
    %c0_0 = arith.constant 0 : index
    %c0_1 = arith.constant 0 : index
    %0 = vector.load %arg1[%c0, %c0_0, %c0_1] : memref<8x8x128xf32, #tpu.memory_space<vmem>>, vector<8x8x128xf32>
    %1 = vector.shape_cast %0 : vector<8x8x128xf32> to vector<64x128xf32>
    %c0_2 = arith.constant 0 : index
    %c0_3 = arith.constant 0 : index
    %2 = vector.load %arg2[%c0_2, %c0_3] : memref<128x16xf32, #tpu.memory_space<vmem>>, vector<128x16xf32>
    %cst = arith.constant dense<0.000000e+00> : vector<64x16xf32>
    %3 = tpu.matmul %1, %2, %cst {dimension_numbers = #tpu.dot_dimension_numbers<[1], [0], [0], [1], [0, 0, 1, 1], [], []>} : vector<64x128xf32>, vector<128x16xf32>, vector<64x16xf32> -> vector<64x16xf32>
    %c0_4 = arith.constant 0 : index
    %c0_5 = arith.constant 0 : index
    %4 = vector.load %arg3[%c0_4, %c0_5] : memref<1x16xf32, #tpu.memory_space<vmem>>, vector<1x16xf32>
    %5 = vector.broadcast %4 : vector<1x16xf32> to vector<64x16xf32>
    %6 = arith.addf %3, %5 : vector<64x16xf32>
    %7 = math.tanh %6 : vector<64x16xf32>
    %8 = vector.shape_cast %7 : vector<64x16xf32> to vector<8x8x16xf32>
    %c0_6 = arith.constant 0 : index
    %c0_7 = arith.constant 0 : index
    %9 = vector.load %arg4[%c0_6, %c0_7] : memref<1x16xf32, #tpu.memory_space<vmem>>, vector<1x16xf32>
    %10 = vector.shape_cast %9 : vector<1x16xf32> to vector<1x1x16xf32>
    %11 = vector.broadcast %10 : vector<1x1x16xf32> to vector<8x8x16xf32>
    %12 = arith.mulf %8, %11 : vector<8x8x16xf32>
    %cst_8 = arith.constant dense<0.000000e+00> : vector<8x8xf32>
    %13 = vector.multi_reduction <add>, %12, %cst_8 [2] : vector<8x8x16xf32> to vector<8x8xf32>
    %cst_9 = arith.constant dense<0xFF800000> : vector<8xf32>
    %14 = vector.multi_reduction <maximumf>, %13, %cst_9 [1] : vector<8x8xf32> to vector<8xf32>
    %15 = vector.shape_cast %14 : vector<8xf32> to vector<8x1xf32>
    %16 = vector.broadcast %15 : vector<8x1xf32> to vector<8x8xf32>
    %17 = arith.subf %13, %16 : vector<8x8xf32>
    %18 = math.exp %17 : vector<8x8xf32>
    %cst_10 = arith.constant dense<0.000000e+00> : vector<8xf32>
    %19 = vector.multi_reduction <add>, %18, %cst_10 [1] : vector<8x8xf32> to vector<8xf32>
    %20 = vector.shape_cast %19 : vector<8xf32> to vector<8x1xf32>
    %21 = tpu.reciprocal %20 : vector<8x1xf32> -> vector<8x1xf32>
    %22 = vector.broadcast %21 : vector<8x1xf32> to vector<8x8xf32>
    %23 = arith.mulf %18, %22 : vector<8x8xf32>
    %24 = vector.shape_cast %23 : vector<8x8xf32> to vector<8x8x1xf32>
    %25 = vector.broadcast %24 : vector<8x8x1xf32> to vector<8x8x128xf32>
    %26 = arith.mulf %25, %0 : vector<8x8x128xf32>
    %cst_11 = arith.constant dense<0.000000e+00> : vector<8x128xf32>
    %27 = vector.multi_reduction <add>, %26, %cst_11 [1] : vector<8x8x128xf32> to vector<8x128xf32>
    %c0_12 = arith.constant 0 : index
    %c0_13 = arith.constant 0 : index
    %28 = vector.load %arg5[%c0_12, %c0_13] : memref<8x128xf32, #tpu.memory_space<vmem>>, vector<8x128xf32>
    tpu.vector_store %arg5[%c0_12, %c0_13], %27 {strides = array<i32>} : memref<8x128xf32, #tpu.memory_space<vmem>>, vector<8x128xf32>,
    return
  }
  func.func @transform_0(%arg0: i32) -> (i32, i32, i32) {
    %c0_i32 = arith.constant 0 : i32
    %c0_i32_0 = arith.constant 0 : i32
    %c0_i32_1 = arith.constant 0 : i32
    return %arg0, %c0_i32, %c0_i32_0 : i32, i32, i32
  }
  func.func @transform_1(%arg0: i32) -> (i32, i32) {
    %c0_i32 = arith.constant 0 : i32
    %c0_i32_0 = arith.constant 0 : i32
    %c0_i32_1 = arith.constant 0 : i32
    return %c0_i32, %c0_i32_0 : i32, i32
  }
  func.func @transform_2(%arg0: i32) -> (i32, i32) {
    %c0_i32 = arith.constant 0 : i32
    %c0_i32_0 = arith.constant 0 : i32
    %c0_i32_1 = arith.constant 0 : i32
    return %c0_i32, %c0_i32_0 : i32, i32
  }
  func.func @transform_3(%arg0: i32) -> (i32, i32) {
    %c0_i32 = arith.constant 0 : i32
    %c0_i32_0 = arith.constant 0 : i32
    %c0_i32_1 = arith.constant 0 : i32
    return %c0_i32, %c0_i32_0 : i32, i32
  }
  func.func @transform_4(%arg0: i32) -> (i32, i32) {
    %c0_i32 = arith.constant 0 : i32
    %c0_i32_0 = arith.constant 0 : i32
    return %arg0, %c0_i32 : i32, i32
  }
}

</mosaic_0001>

<bundles_post_ra>
// kernel: tpu_custom_call.1
= control target key start
LH: loop header
LB: loop body
LE: loop exit
PB: predicated region body
PF: predicated region fallthrough
CT: control target
= control target key end

     0   :  { %9 = vsyncpa [#allocation3], 0  ;;  %s1381_s0 = inlined_call_operand.vmem [shape: f32[16,8,128], index: 0, kind: input, shape index: {}]   ;;  %s1382_s1 = inlined_call_operand.vmem [shape: f32[128,16], index: 1, kind: input, shape index: {}]   ;;  %s1383_s2 = inlined_call_operand.vmem [shape: f32[1,16], index: 2, kind: input, shape index: {}]   ;;  %s1384_s3 = inlined_call_operand.vmem [shape: f32[1,16], index: 3, kind: input, shape index: {}]   ;;  %s1385_s4 = inlined_call_operand.hbm [shape: f32[16,128], index: 4, kind: output, shape index: {}]  }
   0x1   :  { %11 = vsyncpa [#allocation3 + $0x1], 0  ;;  %s1097_s15 = smov 0   ;;  %s1099_s16 = smov 0  }
   0x2   :  { %s1101_s17 = smov 0   ;;  %s1103_s18 = smov 0  }
   0x3 LB: > { %s1118_s19 = sadd.s32 4294967295, %s1068_s18   ;;  %s819_s20 = sadd.s32 4294967294, %s1068_s18   ;;  %s1068_s18 = sphi %s1103_s18, %s1391_s18   ;;  %s1064_s17 = sphi %s1101_s17, %s1390_s17   ;;  %s1060_s16 = sphi %s1099_s16, %s1389_s16   ;;  %s1056_s15 = sphi %s1097_s15, %s1388_s15  }
   0x4   : > { %s1122_s21 = sadd.s32 1, %s1068_s18   ;;  %s113_s22 = sadd.s32 1, %s1064_s17 }
   0x5   : > { %s110_s23 = ssub.s32 %s1068_s18, %s1122_s21  ;;  %p123_p0 = scmp.ne.s32.totalorder %s1064_s17, %s1060_s16 }
   0x6   : > { %p111_p1 = scmp.eq.s32.totalorder %s110_s23, 0  ;;  %p124_p2 = scmp.eq.s32.totalorder %s1118_s19, 1 }
   0x7   : > { %p129_p3 = scmp.ne.s32.totalorder %s1060_s16, %s1056_s15  ;;  %p130_p4 = scmp.eq.s32.totalorder %s819_s20, 1 }
   0x8   : > { %s1133_s24 = scalar_select %p111_p1, %s1064_s17, %s113_s22  }
   0x9   : > { %p1135_p5 = por %p124_p2, %p123_p0  ;;  %p1139_p6 = por %p130_p4, %p129_p3 }
   0xa   : > { %p822_p7 = scmp.ge.s32.totalorder %s1068_s18, 1  ;;  %p166_p8 = scmp.lt.s32.totalorder %s1068_s18, 3 }
   0xc   : > { %p167_p9 = pnand %p822_p7, %p166_p8 }
   0xd   : > { %s824_s11 = sshll.u32 (!%p167_p9), %s1118_s19, 3  ;;  %s189_s8 = sand.u32 (!%p167_p9), 1, %s1060_s16  }
   0xe   : > { %170 = sbr.rel (%p167_p9) target bundleno = 1068 (0x42c), region = 36  ;;  %p193_p10 = scmp.lt.s32.totalorder (!%p167_p9), %s824_s11, 15 }
   0xf   : > { %s823_s9 = sshll.u32 (!%p167_p9), %s189_s8, 3  ;;  %s829_s10 = sshll.u32 (!%p167_p9), %s1118_s19, 7 }
  0x10   : > { %s191_s12 = scalar_lea.vmem (!%p167_p9), [#allocation2], %s823_s9  ;;  %s1343_s20 = scalar_lea.hbm (!%p167_p9), %s1385_s4, %s829_s10 }
  0x11   : > { %s747_s19 = scalar_lea.sflag (!%p167_p9), [#allocation3], %s189_s8  ;;  %s1071_s23 = smov (!%p167_p9), [#allocation2]  }
  0x12   : > { %s1012_s27 = sshll.u32 (!%p167_p9), %s1071_s23, 4  ;;  %s1013_s27 = int_to_ptr.vmem [resolvable:$false] %s1012_s27 }
  0x13   : > { %v221_v0 = vld [vmem:[%s1382_s1 + $0x78] sm:$0xff]  ;;  %v220_v1 = vld [vmem:[%s1382_s1 + $0x70] sm:$0xff]  ;;  %v219_v2 = vld [vmem:[%s1382_s1 + $0x68] sm:$0xff]  ;;  %s1393_s11 = smov (!%p193_p10, %s824_s11), 15  ;;  %vm357_vm0 = vcmask 130048   ;;  %vm424_vm1 = vcmask 1041409  }
  0x14   : > { %856 = vmatprep.subr.mxu0 %v221_v0  ;;  %900 = vmatprep.subr.mxu1 %v221_v0  ;;  %v218_v3 = vld [vmem:[%s1382_s1 + $0x60] sm:$0xff]  ;;  %v217_v4 = vld [vmem:[%s1382_s1 + $0x58] sm:$0xff]  ;;  %v216_v5 = vld [vmem:[%s1382_s1 + $0x50] sm:$0xff]  ;;  %s825_s5 = sshll.u32 %s1393_s11, 3  ;;  %vm426_vm2 = vcmask 1042434   ;;  %vm428_vm3 = vcmask 1043459  }
  0x15   : > { %857 = vmatpush3.msra.mxu0 %v221_v0  ;;  %916 = vmatpush3.msra.mxu1 %v221_v0  ;;  %v215_v6 = vld [vmem:[%s1382_s1 + $0x48] sm:$0xff]  ;;  %v214_v7 = vld [vmem:[%s1382_s1 + $0x40] sm:$0xff]  ;;  %v213_v8 = vld [vmem:[%s1382_s1 + $0x38] sm:$0xff]  ;;  %s1185_s13 = scalar_lea.vmem %s1381_s0, %s825_s5  ;;  %vm430_vm4 = vcmask 1044484   ;;  %vm432_vm5 = vcmask 1045509   ;;  %vm434_vm6 = vcmask 1046534  }
  0x16   : > { %858 = vmatprep.subr.mxu0 %v220_v1  ;;  %901 = vmatprep.subr.mxu1 %v220_v1  ;;  %v212_v9 = vld [vmem:[%s1382_s1 + $0x30] sm:$0xff]  ;;  %v211_v10 = vld [vmem:[%s1382_s1 + $0x28] sm:$0xff]  ;;  %v210_v11 = vld [vmem:[%s1382_s1 + $0x20] sm:$0xff]  ;;  %vm436_vm7 = vcmask 1047559   ;;  %vm439_vm8 = vcmask 64512   ;;  %s1014_s28 = scalar_lea.vmem %s1013_s27, 256 }
  0x17   : > { %859 = vmatpush3.msra.mxu0 %v220_v1  ;;  %917 = vmatpush3.msra.mxu1 %v220_v1  ;;  %v209_v12 = vld [vmem:[%s1382_s1 + $0x18] sm:$0xff]  ;;  %v1191_v13 = vld [vmem:[%s1185_s13] sm:$0xff]  ;;  %v208_v14 = vld [vmem:[%s1382_s1 + $0x10] sm:$0xff] }
  0x18   : > { %860 = vmatprep.subr.mxu0 %v219_v2  ;;  %902 = vmatprep.subr.mxu1 %v219_v2  ;;  %v207_v15 = vld [vmem:[%s1382_s1 + $0x8] sm:$0xff]  ;;  %v206_v16 = vld [vmem:[%s1382_s1] sm:$0xff]  ;;  %v1207_v18 = vld [vmem:[%s1185_s13 + $0x10] sm:$0xff] }
  0x19   : > { %861 = vmatpush3.msra.mxu0 %v219_v2  ;;  %918 = vmatpush3.msra.mxu1 %v219_v2  ;;  %v1204_v17 = vld [vmem:[%s1185_s13 + $0x8] sm:$0xff]  ;;  %v1210_v19 = vld [vmem:[%s1185_s13 + $0x20] sm:$0xff]  ;;  %v1217_v21 = vld [vmem:[%s1185_s13 + $0x30] sm:$0xff]  ;;  %v390_v2 = vlaneseq }
  0x1a   : > { %862 = vmatprep.subr.mxu0 %v218_v3  ;;  %903 = vmatprep.subr.mxu1 %v218_v3  ;;  %v1213_v20 = vld [vmem:[%s1185_s13 + $0x28] sm:$0xff]  ;;  %v1221_v22 = vld [vmem:[%s1185_s13 + $0x18] sm:$0xff]  ;;  %v826_v24 = vld [vmem:[%s1383_s2] ss:$0 sm:$0xff] }
  0x1b   : > { %863 = vmatpush3.msra.mxu0 %v218_v3  ;;  %919 = vmatpush3.msra.mxu1 %v218_v3  ;;  %v1227_v23 = vld [vmem:[%s1185_s13 + $0x38] sm:$0xff]  ;;  %v827_v41 = vld [vmem:[%s1384_s3] ss:$0 sm:$0xff]  ;;  %v391_v3 = vand.u32 127, %v390_v2  ;;  %s760_s13 = sshll.u32 %s191_s12, 4  ;;  %s761_s13 = int_to_ptr.vmem [resolvable:$true] %s760_s13 }
  0x1c   : > { %864 = vmatprep.subr.mxu0 %v217_v4  ;;  %904 = vmatprep.subr.mxu1 %v217_v4  ;;  %s1008_s22 = scalar_lea.vmem %s761_s13, 128  ;;  %p1015_p0 = scmp.lt.s32.totalorder %s761_s13, %s1013_s27 }
  0x1d   : > { %865 = vmatpush3.msra.mxu0 %v217_v4  ;;  %920 = vmatpush3.msra.mxu1 %v217_v4  ;;  %v1245_v4 = vshrl.u32 %v390_v2, 7  ;;  %p1009_p11 = scmp.ne.s32.totalorder %s761_s13, %s1008_s22  ;;  %p1016_p1 = scmp.lt.s32.totalorder %s1014_s28, %s1008_s22 }
  0x1e   : > { %866 = vmatprep.subr.mxu0 %v216_v5  ;;  %905 = vmatprep.subr.mxu1 %v216_v5 }
  0x1f   : > { %867 = vmatpush3.msra.mxu0 %v216_v5  ;;  %921 = vmatpush3.msra.mxu1 %v216_v5  ;;  %p1010_p12 = pnand %p1009_p11, %p1135_p5  ;;  %p1017_p2 = por %p1016_p1, %p1015_p0 }
  0x20   : > { %868 = vmatprep.subr.mxu0 %v215_v6  ;;  %906 = vmatprep.subr.mxu1 %v215_v6 }
  0x21   : > { %869 = vmatpush3.msra.mxu0 %v215_v6  ;;  %922 = vmatpush3.msra.mxu1 %v215_v6  ;;  %v1248_v6 = vsub.s32 %v391_v3, %v1245_v4  ;;  %p1011_p13 = pneg %p1010_p12 }
  0x22   : > { %870 = vmatprep.subr.mxu0 %v214_v7  ;;  %907 = vmatprep.subr.mxu1 %v214_v7 }
  0x23   : > { %871 = vmatpush3.msra.mxu0 %v214_v7  ;;  %923 = vmatpush3.msra.mxu1 %v214_v7  ;;  %p1018_p3 = pnand %p1017_p2, %p1011_p13 }
  0x24   : > { %872 = vmatprep.subr.mxu0 %v213_v8  ;;  %908 = vmatprep.subr.mxu1 %v213_v8 }
  0x25   : > { %873 = vmatpush3.msra.mxu0 %v213_v8  ;;  %924 = vmatpush3.msra.mxu1 %v213_v8 }
  0x26   : > { %874 = vmatprep.subr.mxu0 %v212_v9  ;;  %909 = vmatprep.subr.mxu1 %v212_v9 }
  0x27   : > { %875 = vmatpush3.msra.mxu0 %v212_v9  ;;  %925 = vmatpush3.msra.mxu1 %v212_v9 }
  0x28   : > { %876 = vmatprep.subr.mxu0 %v211_v10  ;;  %910 = vmatprep.subr.mxu1 %v211_v10 }
  0x29   : > { %877 = vmatpush3.msra.mxu0 %v211_v10  ;;  %926 = vmatpush3.msra.mxu1 %v211_v10 }
  0x2a   : > { %878 = vmatprep.subr.mxu0 %v210_v11  ;;  %911 = vmatprep.subr.mxu1 %v210_v11 }
  0x2b   : > { %879 = vmatpush3.msra.mxu0 %v210_v11  ;;  %927 = vmatpush3.msra.mxu1 %v210_v11 }
  0x2c   : > { %880 = vmatprep.subr.mxu0 %v209_v12  ;;  %912 = vmatprep.subr.mxu1 %v209_v12 }
  0x2d   : > { %881 = vmatpush3.msra.mxu0 %v209_v12  ;;  %888 = vmatprep.mubr.f32.mxu0 %v1191_v13 }
  0x2e   : > { %882 = vmatprep.subr.mxu0 %v208_v14  ;;  %928 = vmatpush3.msra.mxu1 %v209_v12 }
  0x2f   : > { %883 = vmatpush3.msra.mxu0 %v208_v14  ;;  %913 = vmatprep.subr.mxu1 %v208_v14 }
  0x30   : > { %884 = vmatprep.subr.mxu0 %v207_v15  ;;  %929 = vmatpush3.msra.mxu1 %v208_v14 }
  0x31   : > { %885 = vmatpush3.msra.mxu0 %v207_v15  ;;  %914 = vmatprep.subr.mxu1 %v207_v15 }
  0x32   : > { %886 = vmatprep.subr.mxu0 %v206_v16  ;;  %930 = vmatpush3.msra.mxu1 %v207_v15 }
  0x33   : > { %887 = vmatpush3.msra.mxu0 %v206_v16  ;;  %915 = vmatprep.subr.mxu1 %v206_v16 }
  0x34   : > { %889 = vmatmul.mubr.f32.vlgmr.msra.gmra.mxu0 %v1204_v17  ;;  %931 = vmatpush3.msra.mxu1 %v206_v16 }
  0x35   : > { %891 = vmatprep.mubr.f32.mxu0 %v1207_v18  ;;  %894 = vmatprep.mubr.f32.mxu1 %v1210_v19 }
  0x36   : > { %895 = vmatmul.mubr.f32.vlgmr.msra.gmra.mxu1 %v1213_v20 }
  0x37   : > { %897 = vmatprep.mubr.f32.mxu1 %v1217_v21 }
  0x38   : > { %892 = vmatmul.mubr.f32.gmra.mxu0 %v1221_v22 }
  0x3a   : > { %898 = vmatmul.mubr.f32.gmra.mxu1 %v1227_v23 }
  0xf4   : > { %v890_v25 = vpop.f32.mrf.mxu0 }
  0xf5   : > { %v301_v26 = vadd.f32 %v890_v25, %v826_v24 }
  0xf6   : > { %v295_v27 = vpop.f32.mrf.mxu0  ;;  %v896_v28 = vpop.f32.mrf.mxu1 }
  0xf7   : > { %974 = vtanh.f32 %v301_v26  ;;  %v296_v29 = vadd.f32 %v826_v24, %v295_v27  ;;  %v321_v35 = vadd.f32 %v896_v28, %v826_v24 }
  0xf8   : > { %v893_v30 = vpop.f32.mrf.mxu0  ;;  %v315_v31 = vpop.f32.mrf.mxu1 }
  0xf9   : > { %976 = vtanh.f32 %v296_v29  ;;  %v311_v32 = vadd.f32 %v893_v30, %v826_v24  ;;  %v316_v33 = vadd.f32 %v826_v24, %v315_v31 }
  0xfa   : > { %v305_v34 = vpop.f32.mrf.mxu0  ;;  %v899_v36 = vpop.f32.mrf.mxu1 }
  0xfb   : > { %978 = vtanh.f32 %v311_v32  ;;  %v306_v37 = vadd.f32 %v826_v24, %v305_v34  ;;  %v331_v40 = vadd.f32 %v899_v36, %v826_v24 }
  0xfc   : > { %980 = vtanh.f32 %v316_v33  ;;  %v325_v38 = vpop.f32.mrf.mxu1 }
  0xfd   : > { %982 = vtanh.f32 %v306_v37  ;;  %v326_v39 = vadd.f32 %v826_v24, %v325_v38  ;;  %v1070_v38 = vmov 0  }
  0xfe   : > { %984 = vtanh.f32 %v321_v35  ;;  %973 = vset.pattern.permute.xlu0 %v1070_v38  ;;  %972 = vset.pattern.permute.xlu1 %v1070_v38 }
  0xff   : > { %986 = vtanh.f32 %v326_v39  ;;  %v446_v39 = vsub.s32 0, %v1245_v4 }
 0x100   : > { %988 = vtanh.f32 %v331_v40  ;;  %v450_v40 = vsub.s32 1, %v1245_v4 }
 0x104   : > { %v975_v42 = vpop.eup %974 }
 0x105   : > { %v350_v43 = vmul.f32 %v975_v42, %v827_v41  ;;  %v458_v42 = vsub.s32 3, %v1245_v4 }
 0x106   : > { %v977_v44 = vpop.eup %976 }
 0x107   : > { %v361_v45 = vsel %vm357_vm0, %v350_v43, 0.0  ;;  %v349_v46 = vmul.f32 %v977_v44, %v827_v41 }
 0x108   : > { %v979_v47 = vpop.eup %978  ;;  %362 = vadd.xlane.f32.xlu0 %v361_v45 }
 0x109   : > { %v981_v48 = vpop.eup %980  ;;  %v352_v49 = vmul.f32 %v979_v47, %v827_v41  ;;  %v358_v54 = vsel %vm357_vm0, %v349_v46, 0.0  ;;  %v462_v47 = vsub.s32 4, %v1245_v4 }
 0x10a   : > { %v983_v50 = vpop.eup %982  ;;  %v353_v51 = vmul.f32 %v981_v48, %v827_v41 }
 0x10b   : > { %v985_v52 = vpop.eup %984  ;;  %v367_v53 = vsel %vm357_vm0, %v352_v49, 0.0  ;;  %v351_v55 = vmul.f32 %v983_v50, %v827_v41 }
 0x10c   : > { %v987_v56 = vpop.eup %986  ;;  %368 = vadd.xlane.f32.xlu1 %v367_v53  ;;  %359 = vadd.xlane.f32.xlu0 %v358_v54  ;;  %v370_v57 = vsel %vm357_vm0, %v353_v51, 0.0  ;;  %v354_v60 = vmul.f32 %v985_v52, %v827_v41  ;;  %v466_v54 = vsub.s32 5, %v1245_v4 }
 0x10d   : > { %v355_v58 = vmul.f32 %v987_v56, %v827_v41  ;;  %v364_v59 = vsel %vm357_vm0, %v351_v55, 0.0  ;;  %v989_v61 = vpop.eup %988 }
 0x10e   : > { %v373_v63 = vsel %vm357_vm0, %v354_v60, 0.0  ;;  %v356_v0 = vmul.f32 %v989_v61, %v827_v41  ;;  %v454_v41 = vsub.s32 2, %v1245_v4 }
 0x10f   : > { %v376_v62 = vsel %vm357_vm0, %v355_v58, 0.0  ;;  %v470_v58 = vsub.s32 6, %v1245_v4 }
 0x110   : > { %365 = vadd.xlane.f32.xlu1 %v364_v59  ;;  %371 = vadd.xlane.f32.xlu0 %v370_v57  ;;  %v379_v1 = vsel %vm357_vm0, %v356_v0, 0.0 }
 0x114   : > { %374 = vadd.xlane.f32.xlu1 %v373_v63  ;;  %377 = vadd.xlane.f32.xlu0 %v376_v62  ;;  %v474_v62 = vsub.s32 7, %v1245_v4 }
 0x118   : > { %380 = vadd.xlane.f32.xlu1 %v379_v1 }
 0x191   : > { %v363_v5 = vpop.xlane.xlu0 %362 }
 0x192   : > { %v399_v10 = vrot.slane %v363_v5, %v1248_v6 }
 0x195   : > { %v369_v7 = vpop.xlane.xlu1 %368  ;;  %v360_v8 = vpop.xlane.xlu0 %359 }
 0x196   : > { %v395_v9 = vrot.slane %v360_v8, %v1248_v6  ;;  %v407_v16 = vrot.slane %v369_v7, %v1248_v6 }
 0x198   : > { %v425_v24 = vsel %vm424_vm1, %v399_v10, %v395_v9 }
 0x199   : > { %v366_v11 = vpop.xlane.xlu1 %365  ;;  %v372_v12 = vpop.xlane.xlu0 %371 }
 0x19a   : > { %v403_v14 = vrot.slane %v366_v11, %v1248_v6  ;;  %v411_v15 = vrot.slane %v372_v12, %v1248_v6 }
 0x19c   : > { %v427_v25 = vsel %vm426_vm2, %v403_v14, %v425_v24 }
 0x19d   : > { %v429_v26 = vsel %vm428_vm3, %v407_v16, %v427_v25  ;;  %v375_v27 = vpop.xlane.xlu1 %374  ;;  %v378_v28 = vpop.xlane.xlu0 %377 }
 0x19e   : > { %v431_v29 = vsel %vm430_vm4, %v411_v15, %v429_v26  ;;  %v415_v30 = vrot.slane %v375_v27, %v1248_v6  ;;  %v419_v31 = vrot.slane %v378_v28, %v1248_v6 }
 0x1a0   : > { %v433_v32 = vsel %vm432_vm5, %v415_v30, %v431_v29 }
 0x1a1   : > { %v381_v33 = vpop.xlane.xlu1 %380  ;;  %v435_v35 = vsel %vm434_vm6, %v419_v31, %v433_v32 }
 0x1a2   : > { %v423_v34 = vrot.slane %v381_v33, %v1248_v6 }
 0x1a4   : > { %v437_v36 = vsel %vm436_vm7, %v423_v34, %v435_v35 }
 0x1a5   : > { %v440_v37 = vsel %vm439_vm8, %v437_v36, -inf }
 0x1a6   : > { %441 = vmax.xlane.f32.xlu0 %v440_v37 }
 0x22f   : > { %v442_v43 = vpop.xlane.xlu0 %441 }
 0x230   : > { %v447_v44 = vrot.slane %v442_v43, %v446_v39  ;;  %v451_v45 = vrot.slane %v442_v43, %v450_v40  ;;  %v455_v46 = vrot.slane %v442_v43, %v454_v41  ;;  %v459_v48 = vrot.slane %v442_v43, %v458_v42 }
 0x231   : > { %v463_v55 = vrot.slane %v442_v43, %v462_v47  ;;  %v467_v59 = vrot.slane %v442_v43, %v466_v54  ;;  %v471_v63 = vrot.slane %v442_v43, %v470_v58  ;;  %v475_v2 = vrot.slane %v442_v43, %v474_v62 }
 0x232   : > { %v484_v49 = vsub.f32 %v360_v8, %v447_v44  ;;  %v485_v50 = vsub.f32 %v363_v5, %v451_v45  ;;  %v486_v51 = vsub.f32 %v366_v11, %v455_v46  ;;  %v487_v56 = vsub.f32 %v369_v7, %v459_v48 }
 0x233   : > { %v488_v60 = vsub.f32 %v372_v12, %v463_v55  ;;  %v489_v0 = vsub.f32 %v375_v27, %v467_v59  ;;  %v490_v3 = vsub.f32 %v378_v28, %v471_v63  ;;  %v491_v9 = vsub.f32 %v381_v33, %v475_v2 }
 0x234   : > { %v492_v52 = vmul.f32 1.442695, %v484_v49  ;;  %v494_v53 = vmul.f32 1.442695, %v485_v50  ;;  %v496_v57 = vmul.f32 1.442695, %v486_v51 }
 0x235   : > { %v498_v61 = vmul.f32 1.442695, %v487_v56  ;;  %v500_v1 = vmul.f32 1.442695, %v488_v60  ;;  %v502_v5 = vmul.f32 1.442695, %v489_v0 }
 0x236   : > { %990 = vpow2.f32 %v492_v52  ;;  %v504_v10 = vmul.f32 1.442695, %v490_v3  ;;  %v506_v12 = vmul.f32 1.442695, %v491_v9 }
 0x237   : > { %992 = vpow2.f32 %v494_v53 }
 0x238   : > { %994 = vpow2.f32 %v496_v57 }
 0x239   : > { %996 = vpow2.f32 %v498_v61 }
 0x23a   : > { %998 = vpow2.f32 %v500_v1 }
 0x23b   : > { %1000 = vpow2.f32 %v502_v5 }
 0x23c   : > { %1002 = vpow2.f32 %v504_v10 }
 0x23d   : > { %1004 = vpow2.f32 %v506_v12 }
 0x243   : > { %v991_v7 = vpop.eup %990 }
 0x244   : > { %v993_v8 = vpop.eup %992  ;;  %517 = vperm.xlu1 %972, %v991_v7  }
 0x245   : > { %520 = vperm.xlu0 %973, %v993_v8   ;;  %v995_v11 = vpop.eup %994 }
 0x246   : > { %v997_v14 = vpop.eup %996 }
 0x247   : > { %v999_v15 = vpop.eup %998 }
 0x248   : > { %523 = vperm.xlu1 %972, %v995_v11   ;;  %v1001_v16 = vpop.eup %1000 }
 0x249   : > { %v1003_v24 = vpop.eup %1002 }
 0x24a   : > { %v1005_v25 = vpop.eup %1004 }
 0x24c   : > { %526 = vperm.xlu1 %972, %v997_v14  }
 0x250   : > { %529 = vperm.xlu1 %972, %v999_v15  }
 0x254   : > { %532 = vperm.xlu1 %972, %v1001_v16  }
 0x258   : > { %535 = vperm.xlu1 %972, %v1003_v24  }
 0x25c   : > { %538 = vperm.xlu1 %972, %v1005_v25  }
 0x2bf   : > { %v518_v26 = vpop.permute.xlu1 %517 }
 0x2c0   : > { %v521_v30 = vpop.permute.xlu0 %520  ;;  %v543_v33 = vrot.slane %v518_v26, %v1248_v6 }
 0x2c1   : > { %v547_v32 = vrot.slane %v521_v30, %v1248_v6 }
 0x2c3   : > { %v524_v27 = vpop.permute.xlu1 %523  ;;  %v572_v38 = vsel %vm424_vm1, %v547_v32, %v543_v33 }
 0x2c4   : > { %v551_v34 = vrot.slane %v524_v27, %v1248_v6 }
 0x2c6   : > { %v573_v44 = vsel %vm426_vm2, %v551_v34, %v572_v38 }
 0x2c7   : > { %v527_v28 = vpop.permute.xlu1 %526 }
 0x2c8   : > { %v555_v35 = vrot.slane %v527_v28, %v1248_v6 }
 0x2ca   : > { %v574_v46 = vsel %vm428_vm3, %v555_v35, %v573_v44 }
 0x2cb   : > { %v530_v29 = vpop.permute.xlu1 %529 }
 0x2cc   : > { %v559_v36 = vrot.slane %v530_v29, %v1248_v6 }
 0x2ce   : > { %v575_v48 = vsel %vm430_vm4, %v559_v36, %v574_v46 }
 0x2cf   : > { %v533_v31 = vpop.permute.xlu1 %532 }
 0x2d0   : > { %v563_v43 = vrot.slane %v533_v31, %v1248_v6 }
 0x2d2   : > { %v576_v50 = vsel %vm432_vm5, %v563_v43, %v575_v48 }
 0x2d3   : > { %v536_v37 = vpop.permute.xlu1 %535 }
 0x2d4   : > { %v567_v45 = vrot.slane %v536_v37, %v1248_v6 }
 0x2d6   : > { %v577_v52 = vsel %vm434_vm6, %v567_v45, %v576_v50 }
 0x2d7   : > { %v539_v49 = vpop.permute.xlu1 %538 }
 0x2d8   : > { %v571_v51 = vrot.slane %v539_v49, %v1248_v6 }
 0x2da   : > { %v578_v53 = vsel %vm436_vm7, %v571_v51, %v577_v52 }
 0x2db   : > { %v580_v55 = vsel %vm439_vm8, %v578_v53, 0.0 }
 0x2dc   : > { %581 = vadd.xlane.f32.xlu1 %v580_v55 }
 0x365   : > { %v582_v56 = vpop.xlane.xlu1 %581 }
 0x366   : > { %1006 = vrcp.f32 %v582_v56 }
 0x373   : > { %v1007_v57 = vpop.eup %1006 }
 0x374   : > { %v588_v59 = vrot.slane %v1007_v57, %v446_v39  ;;  %v592_v61 = vrot.slane %v1007_v57, %v450_v40  ;;  %v596_v6 = vrot.slane %v1007_v57, %v454_v41  ;;  %v600_v1 = vrot.slane %v1007_v57, %v458_v42 }
 0x375   : > { %v604_v3 = vrot.slane %v1007_v57, %v462_v47  ;;  %v608_v40 = vrot.slane %v1007_v57, %v466_v54  ;;  %v612_v41 = vrot.slane %v1007_v57, %v470_v58  ;;  %v616_v42 = vrot.slane %v1007_v57, %v474_v62 }
 0x376   : > { %v625_v60 = vmul.f32 %v991_v7, %v588_v59  ;;  %v626_v63 = vmul.f32 %v993_v8, %v592_v61  ;;  %v627_v0 = vmul.f32 %v995_v11, %v596_v6  ;;  %v628_v2 = vmul.f32 %v997_v14, %v600_v1 }
 0x377   : > { %v629_v39 = vmul.f32 %v999_v15, %v604_v3  ;;  %v630_v5 = vmul.f32 %v1001_v16, %v608_v40  ;;  %v631_v7 = vmul.f32 %v1003_v24, %v612_v41  ;;  %v632_v8 = vmul.f32 %v1005_v25, %v616_v42 }
 0x378   : > { %635 = vperm.xlu0 %973, %v625_v60  }
 0x37c   : > { %640 = vperm.xlu0 %973, %v626_v63  }
 0x380   : > { %645 = vperm.xlu0 %973, %v627_v0  }
 0x384   : > { %650 = vperm.xlu0 %973, %v628_v2  }
 0x388   : > { %655 = vperm.xlu0 %973, %v629_v39  }
 0x38c   : > { %660 = vperm.xlu0 %973, %v630_v5  }
 0x390   : > { %665 = vperm.xlu0 %973, %v631_v7  }
 0x394   : > { %670 = vperm.xlu0 %973, %v632_v8  }
 0x3f3   : > { %v636_v9 = vpop.permute.xlu0 %635 }
 0x3f4   : > { %v673_v12 = vmul.f32 %v636_v9, %v1191_v13 }
 0x3f6   : > { %v681_v24 = vrot.slane %v673_v12, 4 }
 0x3f7   : > { %v641_v47 = vpop.permute.xlu0 %640 }
 0x3f8   : > { %v674_v11 = vmul.f32 %v641_v47, %v1204_v17  ;;  %v682_v28 = vadd.f32 %v681_v24, %v673_v12 }
 0x3fa   : > { %v687_v15 = vrot.slane %v674_v11, 4  ;;  %v683_v33 = vrot.slane %v682_v28, 2 }
 0x3fb   : > { %v646_v10 = vpop.permute.xlu0 %645 }
 0x3fc   : > { %v675_v54 = vmul.f32 %v646_v10, %v1207_v18  ;;  %v688_v26 = vadd.f32 %v687_v15, %v674_v11  ;;  %v684_v44 = vadd.f32 %v683_v33, %v682_v28 }
 0x3fe   : > { %v693_v16 = vrot.slane %v675_v54, 4  ;;  %v689_v31 = vrot.slane %v688_v26, 2  ;;  %v685_v56 = vrot.slane %v684_v44, 1 }
 0x3ff   : > { %v651_v14 = vpop.permute.xlu0 %650 }
 0x400   : > { %v676_v58 = vmul.f32 %v651_v14, %v1221_v22  ;;  %v694_v27 = vadd.f32 %v693_v16, %v675_v54  ;;  %v690_v37 = vadd.f32 %v689_v31, %v688_v26  ;;  %v686_v2 = vadd.f32 %v685_v56, %v684_v44 }
 0x402   : > { %v699_v4 = vrot.slane %v676_v58, 4  ;;  %v695_v32 = vrot.slane %v694_v27, 2 }
 0x403   : > { %v656_v62 = vpop.permute.xlu0 %655 }
 0x404   : > { %v677_v25 = vmul.f32 %v656_v62, %v1210_v19  ;;  %v700_v29 = vadd.f32 %v699_v4, %v676_v58  ;;  %v696_v43 = vadd.f32 %v695_v32, %v694_v27 }
 0x406   : > { %v705_v30 = vrot.slane %v677_v25, 4  ;;  %v701_v34 = vrot.slane %v700_v29, 2  ;;  %v697_v55 = vrot.slane %v696_v43, 1 }
 0x407   : > { %v661_v17 = vpop.permute.xlu0 %660 }
 0x408   : > { %v706_v18 = vadd.f32 %v705_v30, %v677_v25  ;;  %v678_v13 = vmul.f32 %v661_v17, %v1213_v20  ;;  %v702_v45 = vadd.f32 %v701_v34, %v700_v29  ;;  %v691_v20 = vrot.slane %v690_v37, 1 }
 0x409   : > { %v698_v1 = vadd.f32 %v697_v55, %v696_v43 }
 0x40a   : > { %v711_v22 = vrot.slane %v678_v13, 4  ;;  %v707_v35 = vrot.slane %v706_v18, 2  ;;  %v703_v57 = vrot.slane %v702_v45, 1  ;;  %v692_v61 = vadd.f32 %v691_v20, %v690_v37 }
 0x40b   : > { %v666_v36 = vpop.permute.xlu0 %665 }
 0x40c   : > { %v712_v38 = vadd.f32 %v711_v22, %v678_v13  ;;  %v679_v19 = vmul.f32 %v666_v36, %v1217_v21  ;;  %v708_v49 = vadd.f32 %v707_v35, %v706_v18  ;;  %v704_v3 = vadd.f32 %v703_v57, %v702_v45 }
 0x40d   : > { %v737_v5 = vsel %vm424_vm1, %v692_v61, %v686_v2 }
 0x40e   : > { %v713_v46 = vrot.slane %v712_v38, 2  ;;  %v717_v48 = vrot.slane %v679_v19, 4  ;;  %v709_v21 = vrot.slane %v708_v49, 1  ;;  %v738_v42 = vsel %vm426_vm2, %v698_v1, %v737_v5 }
 0x40f   : > { %v671_v50 = vpop.permute.xlu0 %670  ;;  %v739_v9 = vsel %vm428_vm3, %v704_v3, %v738_v42 }
 0x410   : > { %v714_v51 = vadd.f32 %v713_v46, %v712_v38  ;;  %v718_v52 = vadd.f32 %v717_v48, %v679_v19  ;;  %v680_v53 = vmul.f32 %v671_v50, %v1227_v23  ;;  %v710_v23 = vadd.f32 %v709_v21, %v708_v49 }
 0x412   : > { %v719_v59 = vrot.slane %v718_v52, 2  ;;  %v723_v60 = vrot.slane %v680_v53, 4  ;;  %v715_v63 = vrot.slane %v714_v51, 1  ;;  %v740_v10 = vsel %vm430_vm4, %v710_v23, %v739_v9 }
 0x414   : > { %v720_v6 = vadd.f32 %v719_v59, %v718_v52  ;;  %v724_v0 = vadd.f32 %v723_v60, %v680_v53  ;;  %v716_v41 = vadd.f32 %v715_v63, %v714_v51 }
 0x416   : > { %v721_v39 = vrot.slane %v720_v6, 1  ;;  %v725_v40 = vrot.slane %v724_v0, 2  ;;  %v741_v54 = vsel %vm432_vm5, %v716_v41, %v740_v10 }
 0x418   : > { %v726_v7 = vadd.f32 %v725_v40, %v724_v0  ;;  %v722_v8 = vadd.f32 %v721_v39, %v720_v6 }
 0x41a   : > { %v727_v47 = vrot.slane %v726_v7, 1  ;;  %v742_v12 = vsel %vm434_vm6, %v722_v8, %v741_v54 }
 0x41c   : > { %v728_v11 = vadd.f32 %v727_v47, %v726_v7 }
 0x41e   : > { %v743_v14 = vsel %vm436_vm7, %v728_v11, %v742_v12 }
 0x41f   : > { %745 = vst [vmem:[%s191_s12] sm:$0xff] %v743_v14 }
 0x420   : > { %1021 = shalt.err (!%p1018_p3)
}
 0x421   : > { %s1022_s29 = scalar_lea.hbm %s1343_s20, 128  ;;  %s1026_s6 = scalar_lea.hbm %s1385_s4, 256 }
 0x422   : > { %p1023_p4 = scmp.ne.s32.totalorder %s1343_s20, %s1022_s29  ;;  %p1027_p9 = scmp.lt.s32.totalorder %s1343_s20, %s1385_s4 }
 0x423   : > { %p1028_p10 = scmp.lt.s32.totalorder %s1026_s6, %s1022_s29 }
 0x424   : > { %p1024_p7 = pnand %p1023_p4, %p1135_p5 }
 0x425   : > { %p1029_p11 = por %p1028_p10, %p1027_p9 }
 0x426   : > { %p1025_p8 = pneg %p1024_p7 }
 0x428   : > { %p1030_p12 = pnand %p1029_p11, %p1025_p8 }
 0x42a   : > { %1033 = shalt.err (!%p1030_p12)
}
 0x42b   : > { %932 = dma.vmem_to_hbm [thread:$0]  (%p1135_p5), %s761_s13, 128, %s1343_s20, %s747_s19  }
 0x42c PF: > { %p938_p13 = scmp.ge.s32.totalorder %s1068_s18, 2  ;;  %s772_s9 = sand.u32 1, %s1056_s15  }
 0x42d   : > { %s773_s10 = scalar_lea.sflag [#allocation3], %s772_s9 }
 0x42e   : > { %p935_p0 = pnand %p938_p13, %p1139_p6 }
 0x430   : > { %p936_p1 = pneg %p935_p0 }
 0x432   : > { %1051 = dma.done.wait (%p936_p1), %s773_s10, 128  }
 0x433   : > { %1053 = vsyncadd (%p936_p1), %s773_s10, 4294967168  ;;  %p14_p2 = scmp.ge.s32.totalorder %s1122_s21, 4   ;;  %s1388_s15 = smov %s1060_s16 }
 0x434   : > { %s1389_s16 = smov %s1064_s17  ;;  %s1390_s17 = smov %s1133_s24 }
 0x435   : > { %s1391_s18 = smov %s1122_s21  ;;  %16 = sbr.rel (!%p14_p2) target bundleno = 3 (0x3), region = 71 }
 0x43a   :  { %778 = vsyncpa [#allocation3], 1 }
 0x43b   :  { %780 = vsyncpa [#allocation3 + $0x1], 1 }

</bundles_post_ra>
